<compile_context>
chip_gen: v7x
topology: tpu7x:2x2x1
jax: 0.10.0
libtpu: 0.0.40
codegen_flags: <defaults>
</compile_context>

<pallas_src>
import functools

import jax
import jax.numpy as jnp
from jax.experimental import pallas as pl
from jax.experimental.pallas import tpu as pltpu


def _coupling_kernel(f_ref, y_ref,
                     w1_ref, b1_ref,
                     w2_ref, b2_ref,
                     w3_ref, b3_ref,
                     x_ref):
    # f_ref: (R, G*c_F) input dtype;  y_ref: (R, G*dim) f32.  R rows of G packed points.
    y = y_ref[...]                                           # f32, exact for epilogue
    # Layer 1: single MXU pass over the lane-concatenated [F | y] operand against
    # the stacked block-diagonal weight [kron(I,w1f); kron(I,wq)].
    fy = jnp.concatenate([f_ref[...].astype(jnp.float32), y],
                         axis=-1).astype(jnp.bfloat16)       # (R, G*(c_F+dim))
    h1 = jnp.dot(fy, w1_ref[...], preferred_element_type=jnp.float32) + b1_ref[...]
    h1 = jnp.maximum(h1, 0.0).astype(jnp.bfloat16)

    h2 = jnp.dot(h1, w2_ref[...], preferred_element_type=jnp.float32) + b2_ref[...]
    h2 = jnp.maximum(h2, 0.0).astype(jnp.bfloat16)

    t = jnp.dot(h2, w3_ref[...], preferred_element_type=jnp.float32) + b3_ref[...]

    # x = y1 + (1 - mask) * (y - t)  ==  y - (1 - mask) * t ; inv_mask is folded
    # into w3/b3, so simply x = y - t.
    x_ref[...] = (y - t).astype(x_ref.dtype)


def _pick_group(c_F, hidden, dim):
    """Points packed per block row: fill the MXU's 256-wide K/N without blowing
    up the block-diagonal weights quadratically."""
    return max(1, min(8, 256 // max(c_F, hidden, dim)))


def _pick_tm(M, G, target=1024, min_grid=8):
    """Row tile (in points): multiple of 8*G, <= target, and (when M allows)
    at least `min_grid` grid steps so each TensorCore gets several steps."""
    step = 8 * G
    tm = max(step, (min(target, M) // step) * step)
    while tm > step and pl.cdiv(M, tm) < min_grid:
        tm = max(step, (tm // 2 // step) * step)
    return tm


@functools.partial(jax.jit, static_argnames=("tm", "group"))
def coupling_layer_forward(F, y, mask, params, *, tm=None, group=None):
    """F: (B, N, c_F), y: (B, N, dim), mask: (dim,).  Returns x: (B, N, dim)."""
    B, N, c_F = F.shape
    dim = y.shape[-1]
    M = B * N

    wp, bp, w1f, w1p, b1, w2, b2, w3, b3 = params
    hidden = w2.shape[0]

    G = _pick_group(c_F, hidden, dim) if group is None else group
    if tm is None:
        tm = _pick_tm(M, G)
    Mp = pl.cdiv(M, tm) * tm                     # padded row count (item 8)

    # --- one-time algebraic folds (all tiny, done in f32) -------------------
    maskf = mask.astype(jnp.float32)
    inv_mask = (1.0 - maskf).reshape(1, dim)
    # (y*mask) @ wp @ w1p == y @ ((mask[:,None]*wp) @ w1p)
    wq = (maskf[:, None] * wp.astype(jnp.float32)) @ w1p.astype(jnp.float32)     # (dim, hidden)
    b1f = (bp.astype(jnp.float32) @ w1p.astype(jnp.float32)
           + b1.astype(jnp.float32)).reshape(1, hidden)
    w3m = w3.astype(jnp.float32) * inv_mask                   # fold (1-mask), f32 (exact)
    b3m = b3.astype(jnp.float32).reshape(1, dim) * inv_mask

    # Block-diagonal ("point-packed") weights: kron(I_G, W), bf16 operands.
    eye = jnp.eye(G, dtype=jnp.float32)
    w1_bd = jnp.concatenate(
        [jnp.kron(eye, w1f.astype(jnp.float32)), jnp.kron(eye, wq)],
        axis=0).astype(jnp.bfloat16)                           # (G*(c_F+dim), G*hidden)
    w2_bd = jnp.kron(eye, w2.astype(jnp.float32)).astype(jnp.bfloat16)   # (G*h, G*h)
    w3_bd = jnp.kron(eye, w3m).astype(jnp.bfloat16)                      # (G*h, G*dim)
    b1_bd = jnp.tile(b1f, (1, G))                                        # (1, G*hidden)
    b2_bd = jnp.tile(b2.astype(jnp.float32).reshape(1, hidden), (1, G))
    b3_bd = jnp.tile(b3m, (1, G))                                        # (1, G*dim)

    # --- pack the data: free, contiguous reshapes (no wrapper cast of F) ----
    f2 = F.reshape(M, c_F)                       # streamed in incoming dtype (item 4)
    y2 = y.reshape(M, dim).astype(jnp.float32)
    pad = Mp - M
    if pad:                                      # zero-pad tail rows (sliced off below)
        f2 = jnp.pad(f2, ((0, pad), (0, 0)))
        y2 = jnp.pad(y2, ((0, pad), (0, 0)))
    f_pk = f2.reshape(Mp // G, G * c_F)          # lane-dense when G*c_F % 128 == 0
    y_pk = y2.reshape(Mp // G, G * dim)

    R = tm // G                                  # block rows per grid step
    grid = (Mp // tm,)

    flops = 2 * Mp * ((c_F + dim) * hidden + hidden * hidden + hidden * dim)
    bytes_accessed = (Mp * c_F * F.dtype.itemsize            # F read
                      + 2 * Mp * dim * 4                     # y read + x write (f32)
                      + 2 * (w1_bd.size + w2_bd.size + w3_bd.size))   # bf16 weights

    full = lambda shape: pl.BlockSpec(shape, lambda i: (0, 0))

    x_pk = pl.pallas_call(
        _coupling_kernel,
        out_shape=jax.ShapeDtypeStruct((Mp // G, G * dim), y.dtype),
        grid_spec=pltpu.PrefetchScalarGridSpec(
            num_scalar_prefetch=0,
            grid=grid,
            in_specs=[
                pl.BlockSpec((R, G * c_F), lambda i: (i, 0)),    # F (packed)
                pl.BlockSpec((R, G * dim), lambda i: (i, 0)),    # y (packed, f32)
                full((G * (c_F + dim), G * hidden)),             # stacked layer-1 weight
                full((1, G * hidden)),                           # b1'
                full((G * hidden, G * hidden)),                  # layer-2 weight
                full((1, G * hidden)),                           # b2
                full((G * hidden, G * dim)),                     # layer-3 weight (inv_mask folded)
                full((1, G * dim)),                              # b3'
            ],
            out_specs=pl.BlockSpec((R, G * dim), lambda i: (i, 0)),
        ),
        compiler_params=pltpu.CompilerParams(
            dimension_semantics=("parallel",)),
        cost_estimate=pl.CostEstimate(flops=int(flops), transcendentals=0,
                                      bytes_accessed=int(bytes_accessed)),
    )(f_pk, y_pk, w1_bd, b1_bd, w2_bd, b2_bd, w3_bd, b3_bd)

    x = x_pk.reshape(Mp, dim)[:M].reshape(B, N, dim)
    return x


def init_params(key, dim, c_F, c_proj, hidden):
    ks = jax.random.split(key, 8)
    s = lambda k, shp, fan_in: (jax.random.normal(k, shp, jnp.float32)
                                / jnp.sqrt(jnp.float32(fan_in)))
    wp = s(ks[0], (dim, c_proj), dim)
    bp = jnp.zeros((1, c_proj), jnp.float32)
    w1 = s(ks[1], (c_F + c_proj, hidden), c_F + c_proj)
    w1f, w1p = w1[:c_F], w1[c_F:]
    b1 = 0.01 * jax.random.normal(ks[2], (1, hidden), jnp.float32)
    w2 = s(ks[3], (hidden, hidden), hidden)
    b2 = 0.01 * jax.random.normal(ks[4], (1, hidden), jnp.float32)
    w3 = s(ks[5], (hidden, dim), hidden)
    b3 = 0.01 * jax.random.normal(ks[6], (1, dim), jnp.float32)
    return (wp, bp, w1f, w1p, b1, w2, b2, w3, b3)


def reference_forward(F, y, mask, params):
    """Plain-JAX f32 reference mirroring the PyTorch module."""
    wp, bp, w1f, w1p, b1, w2, b2, w3, b3 = params
    y1 = y * mask
    p = y1 @ wp + bp
    h = jnp.concatenate([F, p], axis=-1)
    w1 = jnp.concatenate([w1f, w1p], axis=0)
    h1 = jnp.maximum(h @ w1 + b1, 0.0)
    h2 = jnp.maximum(h1 @ w2 + b2, 0.0)
    t = h2 @ w3 + b3
    return y1 + (1.0 - mask) * (y - t)


if __name__ == "__main__":
    # Small but tile-friendly shapes: M = B*N = 1024 rows -> G=4, tm=128, grid=8.
    B, N, dim = 2, 512, 3
    c_F, c_proj, hidden = 32, 32, 64

    key = jax.random.PRNGKey(0)
    kF, ky, kp = jax.random.split(key, 3)
    F = jax.random.normal(kF, (B, N, c_F), jnp.float32)
    y = jax.random.normal(ky, (B, N, dim), jnp.float32)
    mask = jnp.array([1.0, 0.0, 1.0], jnp.float32)   # NICE-style coordinate mask
    params = init_params(kp, dim, c_F, c_proj, hidden)

    x = coupling_layer_forward(F, y, mask, params)
    jax.block_until_ready(x)

    x_ref = reference_forward(F, y, mask, params)
    assert x.shape == (B, N, dim)
    # bf16 matmul operands (incl. y inside layer 1) with f32 accumulation.
    assert jnp.max(jnp.abs(x - x_ref)) < 5e-2

    # TODO(synk): inverse() pass not implemented (forward only, per spec).
    print("KERNEL_OK")
</pallas_src>

<mosaic_0001>
module attributes {stable_mosaic.version = 11 : i64} {
  func.func @_coupling_kernel(%arg0: i32, %arg1: memref<32x128xf32, #tpu.memory_space<vmem>>, %arg2: memref<32x12xf32, #tpu.memory_space<vmem>>, %arg3: memref<140x256xbf16, #tpu.memory_space<vmem>>, %arg4: memref<1x256xf32, #tpu.memory_space<vmem>>, %arg5: memref<256x256xbf16, #tpu.memory_space<vmem>>, %arg6: memref<1x256xf32, #tpu.memory_space<vmem>>, %arg7: memref<256x12xbf16, #tpu.memory_space<vmem>>, %arg8: memref<1x12xf32, #tpu.memory_space<vmem>>, %arg9: memref<32x12xf32, #tpu.memory_space<vmem>>) attributes {dimension_semantics = [#tpu.dimension_semantics<parallel>], iteration_bounds = array<i64: 8>, scalar_prefetch = 0 : i64, scratch_operands = 0 : i64, tpu.core_type = #tpu.core_type<tc>, window_params = [{transform_indices = @transform_0, window_bounds = array<i64: 32, 128>}, {transform_indices = @transform_1, window_bounds = array<i64: 32, 12>}, {pipeline_mode = #tpu.pipeline_mode<synchronous>, transform_indices = @transform_2, window_bounds = array<i64: 140, 256>}, {pipeline_mode = #tpu.pipeline_mode<synchronous>, transform_indices = @transform_3, window_bounds = array<i64: 1, 256>}, {pipeline_mode = #tpu.pipeline_mode<synchronous>, transform_indices = @transform_4, window_bounds = array<i64: 256, 256>}, {pipeline_mode = #tpu.pipeline_mode<synchronous>, transform_indices = @transform_5, window_bounds = array<i64: 1, 256>}, {pipeline_mode = #tpu.pipeline_mode<synchronous>, transform_indices = @transform_6, window_bounds = array<i64: 256, 12>}, {pipeline_mode = #tpu.pipeline_mode<synchronous>, transform_indices = @transform_7, window_bounds = array<i64: 1, 12>}, {transform_indices = @transform_8, window_bounds = array<i64: 32, 12>}]} {
    %c0 = arith.constant 0 : index
    %c0_0 = arith.constant 0 : index
    %0 = vector.load %arg2[%c0, %c0_0] : memref<32x12xf32, #tpu.memory_space<vmem>>, vector<32x12xf32>
    %c0_1 = arith.constant 0 : index
    %c0_2 = arith.constant 0 : index
    %1 = vector.load %arg1[%c0_1, %c0_2] : memref<32x128xf32, #tpu.memory_space<vmem>>, vector<32x128xf32>
    %2 = tpu.concatenate %1, %0 in 1 : vector<32x128xf32>, vector<32x12xf32> -> vector<32x140xf32>
    %3 = arith.truncf %2 : vector<32x140xf32> to vector<32x140xbf16>
    %c0_3 = arith.constant 0 : index
    %c0_4 = arith.constant 0 : index
    %4 = vector.load %arg3[%c0_3, %c0_4] : memref<140x256xbf16, #tpu.memory_space<vmem>>, vector<140x256xbf16>
    %cst = arith.constant dense<0.000000e+00> : vector<32x256xf32>
    %5 = tpu.matmul %3, %4, %cst {dimension_numbers = #tpu.dot_dimension_numbers<[1], [0], [0], [1], [0, 0, 1, 1], [], []>} : vector<32x140xbf16>, vector<140x256xbf16>, vector<32x256xf32> -> vector<32x256xf32>
    %c0_5 = arith.constant 0 : index
    %c0_6 = arith.constant 0 : index
    %6 = vector.load %arg4[%c0_5, %c0_6] : memref<1x256xf32, #tpu.memory_space<vmem>>, vector<1x256xf32>
    %7 = vector.broadcast %6 : vector<1x256xf32> to vector<32x256xf32>
    %8 = arith.addf %5, %7 : vector<32x256xf32>
    %cst_7 = arith.constant 0.000000e+00 : f32
    %9 = vector.broadcast %cst_7 : f32 to vector<32x256xf32>
    %10 = arith.maximumf %8, %9 : vector<32x256xf32>
    %11 = arith.truncf %10 : vector<32x256xf32> to vector<32x256xbf16>
    %c0_8 = arith.constant 0 : index
    %c0_9 = arith.constant 0 : index
    %12 = vector.load %arg5[%c0_8, %c0_9] : memref<256x256xbf16, #tpu.memory_space<vmem>>, vector<256x256xbf16>
    %cst_10 = arith.constant dense<0.000000e+00> : vector<32x256xf32>
    %13 = tpu.matmul %11, %12, %cst_10 {dimension_numbers = #tpu.dot_dimension_numbers<[1], [0], [0], [1], [0, 0, 1, 1], [], []>} : vector<32x256xbf16>, vector<256x256xbf16>, vector<32x256xf32> -> vector<32x256xf32>
    %c0_11 = arith.constant 0 : index
    %c0_12 = arith.constant 0 : index
    %14 = vector.load %arg6[%c0_11, %c0_12] : memref<1x256xf32, #tpu.memory_space<vmem>>, vector<1x256xf32>
    %15 = vector.broadcast %14 : vector<1x256xf32> to vector<32x256xf32>
    %16 = arith.addf %13, %15 : vector<32x256xf32>
    %cst_13 = arith.constant 0.000000e+00 : f32
    %17 = vector.broadcast %cst_13 : f32 to vector<32x256xf32>
    %18 = arith.maximumf %16, %17 : vector<32x256xf32>
    %19 = arith.truncf %18 : vector<32x256xf32> to vector<32x256xbf16>
    %c0_14 = arith.constant 0 : index
    %c0_15 = arith.constant 0 : index
    %20 = vector.load %arg7[%c0_14, %c0_15] : memref<256x12xbf16, #tpu.memory_space<vmem>>, vector<256x12xbf16>
    %cst_16 = arith.constant dense<0.000000e+00> : vector<32x12xf32>
    %21 = tpu.matmul %19, %20, %cst_16 {dimension_numbers = #tpu.dot_dimension_numbers<[1], [0], [0], [1], [0, 0, 1, 1], [], []>} : vector<32x256xbf16>, vector<256x12xbf16>, vector<32x12xf32> -> vector<32x12xf32>
    %c0_17 = arith.constant 0 : index
    %c0_18 = arith.constant 0 : index
    %22 = vector.load %arg8[%c0_17, %c0_18] : memref<1x12xf32, #tpu.memory_space<vmem>>, vector<1x12xf32>
    %23 = vector.broadcast %22 : vector<1x12xf32> to vector<32x12xf32>
    %24 = arith.addf %21, %23 : vector<32x12xf32>
    %25 = arith.subf %0, %24 : vector<32x12xf32>
    %c0_19 = arith.constant 0 : index
    %c0_20 = arith.constant 0 : index
    %26 = vector.load %arg9[%c0_19, %c0_20] : memref<32x12xf32, #tpu.memory_space<vmem>>, vector<32x12xf32>
    tpu.vector_store %arg9[%c0_19, %c0_20], %25 {strides = array<i32>} : memref<32x12xf32, #tpu.memory_space<vmem>>, vector<32x12xf32>,
    return
  }
  func.func @transform_0(%arg0: i32) -> (i32, i32) {
    %c0_i32 = arith.constant 0 : i32
    %c0_i32_0 = arith.constant 0 : i32
    return %arg0, %c0_i32 : i32, i32
  }
  func.func @transform_1(%arg0: i32) -> (i32, i32) {
    %c0_i32 = arith.constant 0 : i32
    %c0_i32_0 = arith.constant 0 : i32
    return %arg0, %c0_i32 : i32, i32
  }
  func.func @transform_2(%arg0: i32) -> (i32, i32) {
    %c0_i32 = arith.constant 0 : i32
    %c0_i32_0 = arith.constant 0 : i32
    %c0_i32_1 = arith.constant 0 : i32
    return %c0_i32, %c0_i32_0 : i32, i32
  }
  func.func @transform_3(%arg0: i32) -> (i32, i32) {
    %c0_i32 = arith.constant 0 : i32
    %c0_i32_0 = arith.constant 0 : i32
    %c0_i32_1 = arith.constant 0 : i32
    return %c0_i32, %c0_i32_0 : i32, i32
  }
  func.func @transform_4(%arg0: i32) -> (i32, i32) {
    %c0_i32 = arith.constant 0 : i32
    %c0_i32_0 = arith.constant 0 : i32
    %c0_i32_1 = arith.constant 0 : i32
    return %c0_i32, %c0_i32_0 : i32, i32
  }
  func.func @transform_5(%arg0: i32) -> (i32, i32) {
    %c0_i32 = arith.constant 0 : i32
    %c0_i32_0 = arith.constant 0 : i32
    %c0_i32_1 = arith.constant 0 : i32
    return %c0_i32, %c0_i32_0 : i32, i32
  }
  func.func @transform_6(%arg0: i32) -> (i32, i32) {
    %c0_i32 = arith.constant 0 : i32
    %c0_i32_0 = arith.constant 0 : i32
    %c0_i32_1 = arith.constant 0 : i32
    return %c0_i32, %c0_i32_0 : i32, i32
  }
  func.func @transform_7(%arg0: i32) -> (i32, i32) {
    %c0_i32 = arith.constant 0 : i32
    %c0_i32_0 = arith.constant 0 : i32
    %c0_i32_1 = arith.constant 0 : i32
    return %c0_i32, %c0_i32_0 : i32, i32
  }
  func.func @transform_8(%arg0: i32) -> (i32, i32) {
    %c0_i32 = arith.constant 0 : i32
    %c0_i32_0 = arith.constant 0 : i32
    return %arg0, %c0_i32 : i32, i32
  }
}

</mosaic_0001>

<bundles_post_ra>
// kernel: coupling_layer_forward.1
= control target key start
LH: loop header
LB: loop body
LE: loop exit
PB: predicated region body
PF: predicated region fallthrough
CT: control target
= control target key end

     0   :  { %s1333_s27 = smov 0   ;;  %s1593_s0 = inlined_call_operand.vmem [shape: f32[256,128], index: 0, kind: input, shape index: {}]   ;;  %s1594_s1 = inlined_call_operand.vmem [shape: f32[256,12], index: 1, kind: input, shape index: {}]   ;;  %s1595_s2 = inlined_call_operand.vmem [shape: bf16[140,256], index: 2, kind: input, shape index: {}]   ;;  %s1596_s3 = inlined_call_operand.vmem [shape: f32[1,256], index: 3, kind: input, shape index: {}]   ;;  %s1597_s4 = inlined_call_operand.vmem [shape: bf16[256,256], index: 4, kind: input, shape index: {}]   ;;  %s1598_s5 = inlined_call_operand.vmem [shape: f32[1,256], index: 5, kind: input, shape index: {}]   ;;  %s1599_s6 = inlined_call_operand.vmem [shape: bf16[256,12], index: 6, kind: input, shape index: {}]   ;;  %s1600_s7 = inlined_call_operand.vmem [shape: f32[1,12], index: 7, kind: input, shape index: {}]   ;;  %s1601_s8 = inlined_call_operand.vmem [shape: f32[256,12], index: 8, kind: output, shape index: {}]  }
   0x1 LB: > { %s1070_s28 = sadd.s32 4294967295, %s1286_s27   ;;  %p1074_p0 = scmp.ge.s32.totalorder %s1286_s27, 1  ;;  %s1286_s27 = sphi %s1333_s27, %s18_s27  }
   0x2   : > { %p274_p1 = scmp.lt.s32.totalorder %s1286_s27, 9 }
   0x4   : > { %p275_p2 = pnand %p1074_p0, %p274_p1 }
   0x5   : > { %v1189_v0 = vld [vmem:[%s1595_s2 + $0x4] ss:$8 sps:$4 sm:$0xff] (!%p275_p2)   ;;  %s1075_s9 = sshll.u32 (!%p275_p2), %s1070_s28, 2  ;;  %v1191_v1 = vld [vmem:[%s1595_s2] ss:$8 sps:$4 sm:$0xff] (!%p275_p2)   ;;  %vm462_vm0 = vcmask (!%p275_p2), 97280  }
   0x6   : > { %278 = sbr.rel (%p275_p2) target bundleno = 716 (0x2cc), region = 52  ;;  %p314_p3 = scmp.lt.s32.totalorder (!%p275_p2), %s1075_s9, 31  ;;  %476 = vmatprep.subr.bf16.mxu0 (!%p275_p2), %v1189_v0  ;;  %v1192_v2 = vld [vmem:[%s1595_s2 + $0x14] ss:$8 sps:$4 sm:$0xff] (!%p275_p2)   ;;  %v1194_v3 = vld [vmem:[%s1595_s2 + $0x10] ss:$8 sps:$4 sm:$0xff] (!%p275_p2)  }
   0x7   : > { %477 = vmatpush1.bf16.msra.mxu0 (!%p275_p2), %v1191_v1  ;;  %v1195_v4 = vld [vmem:[%s1595_s2 + $0x24] ss:$8 sps:$4 sm:$0xff] (!%p275_p2)   ;;  %v1197_v5 = vld [vmem:[%s1595_s2 + $0x20] ss:$8 sps:$4 sm:$0xff] (!%p275_p2)   ;;  %v1198_v6 = vld [vmem:[%s1595_s2 + $0x34] ss:$8 sps:$4 sm:$0xff] (!%p275_p2)  }
   0x8   : > { %478 = vmatprep.subr.bf16.mxu0 (!%p275_p2), %v1192_v2  ;;  %v1200_v7 = vld [vmem:[%s1595_s2 + $0x30] ss:$8 sps:$4 sm:$0xff] (!%p275_p2)   ;;  %v1201_v9 = vld [vmem:[%s1595_s2 + $0x44] ss:$8 sps:$4 sm:$0xff] (!%p275_p2)   ;;  %v1203_v12 = vld [vmem:[%s1595_s2 + $0x40] ss:$8 sps:$4 sm:$0xff] (!%p275_p2)  }
   0x9   : > { %v1204_v13 = vld [vmem:[%s1595_s2 + $0x54] ss:$8 sps:$4 sm:$0xff] (!%p275_p2)   ;;  %v1216_v14 = vld [vmem:[%s1597_s4 + $0x4] ss:$8 sps:$4 sm:$0xff] (!%p275_p2)   ;;  %v1218_v15 = vld [vmem:[%s1597_s4] ss:$8 sps:$4 sm:$0xff] (!%p275_p2)  }
   0xa   : > { %v1219_v16 = vld [vmem:[%s1597_s4 + $0x14] ss:$8 sps:$4 sm:$0xff] (!%p275_p2)   ;;  %745 = vmatprep.subr.bf16.mxu1 (!%p275_p2), %v1216_v14  ;;  %v1221_v17 = vld [vmem:[%s1597_s4 + $0x10] ss:$8 sps:$4 sm:$0xff] (!%p275_p2)   ;;  %v1222_v19 = vld [vmem:[%s1597_s4 + $0x24] ss:$8 sps:$4 sm:$0xff] (!%p275_p2)  }
   0xb   : > { %479 = vmatpush1.bf16.msra.mxu0 (!%p275_p2), %v1194_v3  ;;  %746 = vmatpush1.bf16.msra.mxu1 (!%p275_p2), %v1218_v15  ;;  %v1206_v18 = vld [vmem:[%s1595_s2 + $0x50] ss:$8 sps:$4 sm:$0xff] (!%p275_p2)   ;;  %v1207_v20 = vld [vmem:[%s1595_s2 + $0x64] ss:$8 sps:$4 sm:$0xff] (!%p275_p2)   ;;  %v1224_v21 = vld [vmem:[%s1597_s4 + $0x20] ss:$8 sps:$4 sm:$0xff] (!%p275_p2)  }
   0xc   : > { %480 = vmatprep.subr.bf16.mxu0 (!%p275_p2), %v1195_v4  ;;  %747 = vmatprep.subr.bf16.mxu1 (!%p275_p2), %v1219_v16  ;;  %v1209_v22 = vld [vmem:[%s1595_s2 + $0x60] ss:$8 sps:$4 sm:$0xff] (!%p275_p2)   ;;  %v1225_v23 = vld [vmem:[%s1597_s4 + $0x34] ss:$8 sps:$4 sm:$0xff] (!%p275_p2)   ;;  %v1212_v25 = vld [vmem:[%s1595_s2 + $0x70] ss:$8 sps:$4 sm:$0xff] (!%p275_p2)  }
   0xd   : > { %s1603_s9 = smov (!%p314_p3, %s1075_s9), 31  ;;  %v1210_v24 = vld [vmem:[%s1595_s2 + $0x74] ss:$8 sps:$4 sm:$0xff]   ;;  %v1227_v26 = vld [vmem:[%s1597_s4 + $0x30] ss:$8 sps:$4 sm:$0xff]   ;;  %vm469_vm1 = vcmask 1045504  }
   0xe   : > { %s1356_s18 = sshll.u32 %s1603_s9, 3  ;;  %v1213_v27 = vld [vmem:[%s1595_s2 + $0x84] ss:$8 sps:$4 sm:$0x3f]   ;;  %v1230_v33 = vld [vmem:[%s1597_s4 + $0x40] ss:$8 sps:$4 sm:$0xff]  }
   0xf   : > { %s1368_s25 = scalar_lea.vmem %s1594_s1, %s1356_s18  ;;  %481 = vmatpush1.bf16.msra.mxu0 %v1197_v5  ;;  %748 = vmatpush1.bf16.msra.mxu1 %v1221_v17  ;;  %s317_s21 = scalar_lea.vmem %s1593_s0, %s1356_s18  ;;  %v1228_v28 = vld [vmem:[%s1597_s4 + $0x44] ss:$8 sps:$4 sm:$0xff]   ;;  %v1215_v29 = vld [vmem:[%s1595_s2 + $0x80] ss:$8 sps:$4 sm:$0x3f]   ;;  %v1268_v3 = vld [vmem:[%s1599_s6 + $0x50] sm:$0xff]  }
  0x10   : > { %v1374_v8 = vld [vmem:[%s1368_s25] sm:$0xff]  ;;  %482 = vmatprep.subr.bf16.mxu0 %v1198_v6  ;;  %v1380_v10 = vld [vmem:[%s1368_s25 + $0x8] sm:$0xff]  ;;  %749 = vmatprep.subr.bf16.mxu1 %v1222_v19  ;;  %v1444_v32 = vld [vmem:[%s1368_s25 + $0x10] sm:$0xff]  ;;  %v471_v36 = vsel %vm469_vm1, %v1215_v29, 0  ;;  %s329_s16 = scalar_lea.vmem %s1601_s8, %s1356_s18 }
  0x11   : > { %v341_v11 = vpack.c.bf16 %v1380_v10, %v1374_v8  ;;  %v336_v30 = vld [vmem:[%s317_s21] sm:$0xff]  ;;  %v337_v31 = vld [vmem:[%s317_s21 + $0x8] sm:$0xff]  ;;  %v1450_v34 = vld [vmem:[%s1368_s25 + $0x18] sm:$0xff] }
  0x12   : > { %v1231_v35 = vld [vmem:[%s1597_s4 + $0x54] ss:$8 sps:$4 sm:$0xff]   ;;  %v1233_v37 = vld [vmem:[%s1597_s4 + $0x50] ss:$8 sps:$4 sm:$0xff]   ;;  %v1234_v38 = vld [vmem:[%s1597_s4 + $0x64] ss:$8 sps:$4 sm:$0xff]   ;;  %v340_v39 = vpack.c.bf16 %v337_v31, %v336_v30  ;;  %v343_v40 = vpack.c.bf16 %v1450_v34, %v1444_v32 }
  0x13   : > { %483 = vmatpush1.bf16.msra.mxu0 %v1200_v7  ;;  %1100 = vmatprep.mubr.msk.bf16.mxu0 %vm462_vm0, %v341_v11  ;;  %v1236_v41 = vld [vmem:[%s1597_s4 + $0x60] ss:$8 sps:$4 sm:$0xff]   ;;  %v338_v42 = vld [vmem:[%s317_s21 + $0x10] sm:$0xff]  ;;  %v339_v43 = vld [vmem:[%s317_s21 + $0x18] sm:$0xff] }
  0x14   : > { %484 = vmatprep.subr.bf16.mxu0 %v1201_v9  ;;  %750 = vmatpush1.bf16.msra.mxu1 %v1224_v21  ;;  %v1237_v44 = vld [vmem:[%s1597_s4 + $0x74] ss:$8 sps:$4 sm:$0xff]   ;;  %v1239_v45 = vld [vmem:[%s1597_s4 + $0x70] ss:$8 sps:$4 sm:$0xff]   ;;  %v1240_v46 = vld [vmem:[%s1597_s4 + $0x84] ss:$8 sps:$4 sm:$0xff]   ;;  %v342_v47 = vpack.c.bf16 %v339_v43, %v338_v42 }
  0x15   : > { %751 = vmatprep.subr.bf16.mxu1 %v1225_v23  ;;  %v1242_v48 = vld [vmem:[%s1597_s4 + $0x80] ss:$8 sps:$4 sm:$0xff]   ;;  %v1243_v49 = vld [vmem:[%s1597_s4 + $0x94] ss:$8 sps:$4 sm:$0xff]   ;;  %v1245_v50 = vld [vmem:[%s1597_s4 + $0x90] ss:$8 sps:$4 sm:$0xff]  }
  0x16   : > { %v1246_v51 = vld [vmem:[%s1597_s4 + $0xa4] ss:$8 sps:$4 sm:$0xff]   ;;  %v1248_v52 = vld [vmem:[%s1597_s4 + $0xa0] ss:$8 sps:$4 sm:$0xff]   ;;  %v1249_v53 = vld [vmem:[%s1597_s4 + $0xb4] ss:$8 sps:$4 sm:$0xff]  }
  0x17   : > { %485 = vmatpush1.bf16.msra.mxu0 %v1203_v12  ;;  %v1251_v54 = vld [vmem:[%s1597_s4 + $0xb0] ss:$8 sps:$4 sm:$0xff]   ;;  %v1252_v55 = vld [vmem:[%s1597_s4 + $0xc4] ss:$8 sps:$4 sm:$0xff]   ;;  %v1254_v56 = vld [vmem:[%s1597_s4 + $0xc0] ss:$8 sps:$4 sm:$0xff]   ;;  %v364_v12 = vlaneseq }
  0x18   : > { %486 = vmatprep.subr.bf16.mxu0 %v1204_v13  ;;  %752 = vmatpush1.bf16.msra.mxu1 %v1227_v26  ;;  %v1255_v57 = vld [vmem:[%s1597_s4 + $0xd4] ss:$8 sps:$4 sm:$0xff]   ;;  %v1257_v58 = vld [vmem:[%s1597_s4 + $0xd0] ss:$8 sps:$4 sm:$0xff]   ;;  %v1258_v59 = vld [vmem:[%s1597_s4 + $0xe4] ss:$8 sps:$4 sm:$0xff]  }
  0x19   : > { %753 = vmatprep.subr.bf16.mxu1 %v1228_v28  ;;  %v1260_v60 = vld [vmem:[%s1597_s4 + $0xe0] ss:$8 sps:$4 sm:$0xff]   ;;  %v1261_v61 = vld [vmem:[%s1597_s4 + $0xf4] ss:$8 sps:$4 sm:$0xff]   ;;  %v1263_v62 = vld [vmem:[%s1597_s4 + $0xf0] ss:$8 sps:$4 sm:$0xff]  }
  0x1a   : > { %v1264_v63 = vld [vmem:[%s1599_s6 + $0x40] sm:$0xff]   ;;  %v1266_v1 = vld [vmem:[%s1599_s6 + $0x48] sm:$0xff]   ;;  %v1269_v4 = vld [vmem:[%s1599_s6 + $0x10] sm:$0xff]   ;;  %v365_v13 = vshrl.u32 %v364_v12, 7 }
  0x1b   : > { %487 = vmatpush1.bf16.msra.mxu0 %v1206_v18  ;;  %v1265_v0 = vld [vmem:[%s1599_s6] sm:$0xff]   ;;  %v1267_v2 = vld [vmem:[%s1599_s6 + $0x8] sm:$0xff]   ;;  %v1270_v5 = vld [vmem:[%s1599_s6 + $0x58] sm:$0xff]  }
  0x1c   : > { %488 = vmatprep.subr.bf16.mxu0 %v1207_v20  ;;  %754 = vmatpush1.bf16.msra.mxu1 %v1230_v33  ;;  %v1271_v6 = vld [vmem:[%s1599_s6 + $0x18] sm:$0xff]   ;;  %v1272_v7 = vld [vmem:[%s1599_s6 + $0x60] sm:$0xff]   ;;  %v1274_v11 = vld [vmem:[%s1599_s6 + $0x68] sm:$0xff]   ;;  %v366_v14 = vsub.s32 0, %v365_v13  ;;  %v370_v16 = vsub.s32 1, %v365_v13 }
  0x1d   : > { %755 = vmatprep.subr.bf16.mxu1 %v1231_v35  ;;  %v1273_v9 = vld [vmem:[%s1599_s6 + $0x20] sm:$0xff]  }
  0x1e   : > { %v362_v15 = vld [vmem:[%s1596_s3] sm:$0x3] }
  0x1f   : > { %489 = vmatpush1.bf16.msra.mxu0 %v1209_v22  ;;  %v367_v17 = vrot.slane %v362_v15, %v366_v14  ;;  %v371_v18 = vrot.slane %v362_v15, %v370_v16 }
  0x20   : > { %490 = vmatprep.subr.bf16.mxu0 %v1210_v24  ;;  %756 = vmatpush1.bf16.msra.mxu1 %v1233_v37 }
  0x21   : > { %757 = vmatprep.subr.bf16.mxu1 %v1234_v38 }
  0x23   : > { %491 = vmatpush1.bf16.msra.mxu0 %v1212_v25 }
  0x24   : > { %1099 = vmatprep.subr.msk.bf16.mxu0 %vm469_vm1, %v1213_v27  ;;  %758 = vmatpush1.bf16.msra.mxu1 %v1236_v41 }
  0x25   : > { %759 = vmatprep.subr.bf16.mxu1 %v1237_v44 }
  0x27   : > { %493 = vmatpush1.bf16.msra.mxu0 %v471_v36 }
  0x28   : > { %760 = vmatpush1.bf16.msra.mxu1 %v1239_v45  ;;  %1153 = vmatprep.subr.bf16.mxu0 %v1264_v63 }
  0x29   : > { %761 = vmatprep.subr.bf16.mxu1 %v1240_v46 }
  0x2a   : > { %509 = vmatmul.mubr.bf16.vlgmr.msra.gmra.mrb[0].mxu0 %v340_v39 }
  0x2b   : > { %1101 = vmatprep.mubr.msk.bf16.mxu0 %vm462_vm0, %v343_v40  ;;  %1154 = vmatpush3.bf16.msra.mxu0 %v1265_v0 }
  0x2c   : > { %762 = vmatpush1.bf16.msra.mxu1 %v1242_v48  ;;  %1155 = vmatprep.subr.bf16.mxu0 %v1266_v1 }
  0x2d   : > { %763 = vmatprep.subr.bf16.mxu1 %v1243_v49  ;;  %v1275_v49 = vld [vmem:[%s1599_s6 + $0x28] sm:$0xff]  }
  0x2f   : > { %1156 = vmatpush3.bf16.msra.mxu0 %v1267_v2 }
  0x30   : > { %764 = vmatpush1.bf16.msra.mxu1 %v1245_v50  ;;  %1157 = vmatprep.subr.bf16.mxu0 %v1268_v3  ;;  %v1276_v50 = vld [vmem:[%s1599_s6 + $0x70] sm:$0xff]  }
  0x31   : > { %765 = vmatprep.subr.bf16.mxu1 %v1246_v51  ;;  %v1277_v51 = vld [vmem:[%s1599_s6 + $0x30] sm:$0xff]  }
  0x32   : > { %519 = vmatmul.mubr.bf16.gmra.mrb[4].mxu0 %v342_v47 }
  0x33   : > { %1158 = vmatpush3.bf16.msra.mxu0 %v1269_v4 }
  0x34   : > { %766 = vmatpush1.bf16.msra.mxu1 %v1248_v52  ;;  %1159 = vmatprep.subr.bf16.mxu0 %v1270_v5  ;;  %v1278_v52 = vld [vmem:[%s1599_s6 + $0x78] sm:$0xff]  }
  0x35   : > { %767 = vmatprep.subr.bf16.mxu1 %v1249_v53  ;;  %v1279_v53 = vld [vmem:[%s1599_s6 + $0x38] sm:$0xff]  }
  0x37   : > { %1160 = vmatpush3.bf16.msra.mxu0 %v1271_v6 }
  0x38   : > { %768 = vmatpush1.bf16.msra.mxu1 %v1251_v54  ;;  %1161 = vmatprep.subr.bf16.mxu0 %v1272_v7  ;;  %v573_v54 = vld [vmem:[%s1598_s5] sm:$0x3] }
  0x39   : > { %769 = vmatprep.subr.bf16.mxu1 %v1252_v55  ;;  %v578_v55 = vrot.slane %v573_v54, %v366_v14 }
  0x3b   : > { %1162 = vmatpush3.bf16.msra.mxu0 %v1273_v9 }
  0x3c   : > { %770 = vmatpush1.bf16.msra.mxu1 %v1254_v56  ;;  %1163 = vmatprep.subr.bf16.mxu0 %v1274_v11  ;;  %v582_v56 = vrot.slane %v573_v54, %v370_v16 }
  0x3d   : > { %771 = vmatprep.subr.bf16.mxu1 %v1255_v57 }
  0x3f   : > { %1164 = vmatpush3.bf16.msra.mxu0 %v1275_v49 }
  0x40   : > { %772 = vmatpush1.bf16.msra.mxu1 %v1257_v58  ;;  %1165 = vmatprep.subr.bf16.mxu0 %v1276_v50 }
  0x41   : > { %773 = vmatprep.subr.bf16.mxu1 %v1258_v59 }
  0x43   : > { %1166 = vmatpush3.bf16.msra.mxu0 %v1277_v51 }
  0x44   : > { %774 = vmatpush1.bf16.msra.mxu1 %v1260_v60  ;;  %1167 = vmatprep.subr.bf16.mxu0 %v1278_v52 }
  0x45   : > { %775 = vmatprep.subr.bf16.mxu1 %v1261_v61 }
  0x47   : > { %1168 = vmatpush3.bf16.msra.mxu0 %v1279_v53 }
  0x48   : > { %776 = vmatpush1.bf16.msra.mxu1 %v1263_v62 }
  0xfd   : > { %v510_v19 = vpop.f32.mrb[0].mxu0 }
  0xfe   : > { %v511_v20 = vadd.f32 %v510_v19, %v367_v17  ;;  %v512_v21 = vpop.f32.mrb[1].mxu0 }
  0xff   : > { %v513_v22 = vadd.f32 %v512_v21, %v371_v18  ;;  %v514_v23 = vpop.f32.mrb[2].mxu0 }
 0x100   : > { %v515_v24 = vadd.f32 %v514_v23, %v367_v17  ;;  %v516_v25 = vpop.f32.mrb[3].mxu0  ;;  %v529_v27 = vmax.f32 %v511_v20, 0.0 }
 0x101   : > { %v517_v26 = vadd.f32 %v516_v25, %v371_v18  ;;  %v530_v29 = vmax.f32 %v513_v22, 0.0 }
 0x102   : > { %v531_v28 = vmax.f32 %v515_v24, 0.0  ;;  %v1134_v24 = vld [vmem:[%s1600_s7] ss:$0 sm:$0xff] }
 0x103   : > { %v532_v30 = vmax.f32 %v517_v26, 0.0 }
 0x104   : > { %v537_v31 = vpack.c.bf16 %v531_v28, %v529_v27 }
 0x105   : > { %v520_v33 = vpop.f32.mrb[4].mxu0  ;;  %v538_v35 = vpack.c.bf16 %v532_v30, %v530_v29 }
 0x106   : > { %v521_v36 = vadd.f32 %v520_v33, %v367_v17  ;;  %v522_v37 = vpop.f32.mrb[5].mxu0 }
 0x107   : > { %v523_v38 = vadd.f32 %v522_v37, %v371_v18  ;;  %v524_v39 = vpop.f32.mrb[6].mxu0  ;;  %777 = vmatprep.mubr.bf16.mxu1 %v538_v35 }
 0x108   : > { %v525_v40 = vadd.f32 %v524_v39, %v367_v17  ;;  %v526_v41 = vpop.f32.mrb[7].mxu0  ;;  %778 = vmatmul.mubr.bf16.vlgmr.msra.gmra.mrb[0].mxu1 %v537_v31  ;;  %v533_v43 = vmax.f32 %v521_v36, 0.0 }
 0x109   : > { %v527_v42 = vadd.f32 %v526_v41, %v371_v18  ;;  %v534_v45 = vmax.f32 %v523_v38, 0.0 }
 0x10a   : > { %v535_v44 = vmax.f32 %v525_v40, 0.0 }
 0x10b   : > { %v536_v46 = vmax.f32 %v527_v42, 0.0 }
 0x10c   : > { %v539_v47 = vpack.c.bf16 %v535_v44, %v533_v43 }
 0x10d   : > { %v540_v48 = vpack.c.bf16 %v536_v46, %v534_v45 }
 0x10f   : > { %787 = vmatprep.mubr.bf16.mxu1 %v540_v48 }
 0x110   : > { %788 = vmatmul.mubr.bf16.gmra.mrb[4].mxu1 %v539_v47 }
 0x1db   : > { %v779_v57 = vpop.f32.mrb[0].mxu1 }
 0x1dc   : > { %v780_v58 = vadd.f32 %v779_v57, %v578_v55  ;;  %v781_v59 = vpop.f32.mrb[1].mxu1 }
 0x1dd   : > { %v782_v60 = vadd.f32 %v781_v59, %v582_v56  ;;  %v783_v61 = vpop.f32.mrb[2].mxu1 }
 0x1de   : > { %v784_v62 = vadd.f32 %v783_v61, %v578_v55  ;;  %v785_v63 = vpop.f32.mrb[3].mxu1  ;;  %v798_v1 = vmax.f32 %v780_v58, 0.0 }
 0x1df   : > { %v786_v0 = vadd.f32 %v785_v63, %v582_v56  ;;  %v799_v3 = vmax.f32 %v782_v60, 0.0 }
 0x1e0   : > { %v800_v2 = vmax.f32 %v784_v62, 0.0 }
 0x1e1   : > { %v801_v4 = vmax.f32 %v786_v0, 0.0 }
 0x1e2   : > { %v806_v5 = vpack.c.bf16 %v800_v2, %v798_v1 }
 0x1e3   : > { %v807_v6 = vpack.c.bf16 %v801_v4, %v799_v3  ;;  %v789_v7 = vpop.f32.mrb[4].mxu1 }
 0x1e4   : > { %v790_v9 = vadd.f32 %v789_v7, %v578_v55  ;;  %v791_v11 = vpop.f32.mrb[5].mxu1 }
 0x1e5   : > { %v792_v12 = vadd.f32 %v791_v11, %v582_v56  ;;  %v793_v13 = vpop.f32.mrb[6].mxu1  ;;  %977 = vmatprep.mubr.bf16.mxu0 %v807_v6 }
 0x1e6   : > { %v794_v14 = vadd.f32 %v793_v13, %v578_v55  ;;  %v795_v15 = vpop.f32.mrb[7].mxu1  ;;  %978 = vmatmul.mubr.bf16.vlgmr.msra.gmra.mrb[8].mxu0 %v806_v5  ;;  %v802_v17 = vmax.f32 %v790_v9, 0.0 }
 0x1e7   : > { %v796_v16 = vadd.f32 %v795_v15, %v582_v56  ;;  %v803_v19 = vmax.f32 %v792_v12, 0.0 }
 0x1e8   : > { %v804_v18 = vmax.f32 %v794_v14, 0.0 }
 0x1e9   : > { %v805_v20 = vmax.f32 %v796_v16, 0.0 }
 0x1ea   : > { %v808_v21 = vpack.c.bf16 %v804_v18, %v802_v17 }
 0x1eb   : > { %v809_v22 = vpack.c.bf16 %v805_v20, %v803_v19 }
 0x1ed   : > { %985 = vmatprep.mubr.bf16.mxu0 %v809_v22 }
 0x1ee   : > { %986 = vmatmul.mubr.bf16.gmra.mrb[12].mxu0 %v808_v21 }
 0x2b9   : > { %v1169_v23 = vpop.f32.mrb[8].mxu0 }
 0x2ba   : > { %v1170_v25 = vpop.f32.mrb[9].mxu0 }
 0x2bb   : > { %v1171_v26 = vadd.f32 %v1170_v25, %v1169_v23  ;;  %v1172_v27 = vpop.f32.mrb[10].mxu0 }
 0x2bc   : > { %v1173_v28 = vpop.f32.mrb[11].mxu0 }
 0x2bd   : > { %v980_v29 = vadd.f32 %v1171_v26, %v1134_v24  ;;  %v1174_v30 = vadd.f32 %v1173_v28, %v1172_v27 }
 0x2bf   : > { %v994_v31 = vsub.f32 %v1374_v8, %v980_v29  ;;  %v983_v33 = vadd.f32 %v1174_v30, %v1134_v24 }
 0x2c1   : > { %998 = vst.msk [vmem:[%s329_s16] sm:$0xff] %vm462_vm0, %v994_v31  ;;  %v995_v35 = vsub.f32 %v1380_v10, %v983_v33  ;;  %v1175_v36 = vpop.f32.mrb[12].mxu0 }
 0x2c2   : > { %v1176_v37 = vpop.f32.mrb[13].mxu0 }
 0x2c3   : > { %999 = vst.msk [vmem:[%s329_s16 + $0x8] sm:$0xff] %vm462_vm0, %v995_v35  ;;  %v1177_v38 = vadd.f32 %v1176_v37, %v1175_v36  ;;  %v1178_v39 = vpop.f32.mrb[14].mxu0 }
 0x2c4   : > { %v1179_v40 = vpop.f32.mrb[15].mxu0 }
 0x2c5   : > { %v988_v41 = vadd.f32 %v1177_v38, %v1134_v24  ;;  %v1180_v42 = vadd.f32 %v1179_v40, %v1178_v39 }
 0x2c7   : > { %v996_v43 = vsub.f32 %v1444_v32, %v988_v41  ;;  %v991_v44 = vadd.f32 %v1180_v42, %v1134_v24 }
 0x2c9   : > { %1000 = vst.msk [vmem:[%s329_s16 + $0x10] sm:$0xff] %vm462_vm0, %v996_v43  ;;  %v997_v8 = vsub.f32 %v1450_v34, %v991_v44 }
 0x2cb   : > { %1001 = vst.msk [vmem:[%s329_s16 + $0x18] sm:$0xff] %vm462_vm0, %v997_v8 }
 0x2cc PF: > { %s18_s27 = sadd.s32 1, %s1286_s27  }
 0x2cd   : > { %p15_p4 = scmp.ge.s32.totalorder %s18_s27, 10  }
 0x2cf   :  { %17 = sbr.rel (!%p15_p4) target bundleno = 1 (0x1), region = 85 }

</bundles_post_ra>
